<compile_context>
chip_gen: v5e
topology: v5e:2x2
jax: 0.10.0
libtpu: 0.0.40
codegen_flags: <defaults>
</compile_context>

<pallas_src>
import numpy as np
import jax
import jax.numpy as jnp
from jax.experimental import pallas as pl
from jax.experimental.pallas import tpu as pltpu


def construct_log_spaced_freqs(max_num_frames: int, skip_small_t_freqs: int = 0):
    """Same math as the PyTorch helper, in numpy. Returns (1, F) float32."""
    time_resolution = 2 ** np.ceil(np.log2(max_num_frames))
    num_fourier_feats = int(np.ceil(np.log2(time_resolution)))
    powers = 2 ** np.arange(num_fourier_feats)
    powers = powers[: len(powers) - skip_small_t_freqs]
    fourier_coefs = powers[None, :].astype(np.float32) * np.pi
    return (fourier_coefs / time_resolution).astype(np.float32)  # (1, F)


def _round_up(x: int, m: int) -> int:
    return ((x + m - 1) // m) * m


def _make_time_encoder_kernel(coef_values, out_dtype):
    """Build a kernel closure with the F coefficients baked in as scalars."""
    f = len(coef_values)

    def kernel(t_ref, out_ref):
        # t_ref:   (1, TILE_M)  f32   (flattened batch axis on the lane axis)
        # out_ref: (2F, TILE_M) out_dtype
        t = t_ref[...]  # (1, TILE_M) f32
        # Unrolled static loop over the (tiny) Fourier-feature axis.
        for k, c in enumerate(coef_values):
            raw = t * c                                           # scalar * vreg
            out_ref[pl.ds(k, 1), :] = jnp.sin(raw).astype(out_dtype)
            out_ref[pl.ds(f + k, 1), :] = jnp.cos(raw).astype(out_dtype)

    return kernel


def fixed_time_encode_pallas(t_flat, coefs, *, tile_m_max: int = 4096,
                             out_dtype=jnp.float32):
    """t_flat: (M,) array. coefs: (1, F) float32 (numpy or jax). Returns (M, 2F)."""
    m = int(t_flat.shape[0])
    coefs_np = np.asarray(coefs, dtype=np.float32).reshape(-1)
    f = int(coefs_np.shape[0])
    coef_values = [float(c) for c in coefs_np]

    assert tile_m_max % 128 == 0
    m128 = _round_up(max(m, 1), 128)
    tile_m = min(tile_m_max, m128)
    m_pad = _round_up(m128, tile_m)
    grid_m = pl.cdiv(m_pad, tile_m)

    # Pad with zeros (sin(0)=0 / cos(0)=1 land in columns we slice off).
    t_row = jnp.zeros((1, m_pad), jnp.float32)
    t_row = t_row.at[0, :m].set(t_flat.astype(jnp.float32))

    kernel = _make_time_encoder_kernel(coef_values, out_dtype)

    out_t = pl.pallas_call(
        kernel,
        out_shape=jax.ShapeDtypeStruct((2 * f, m_pad), out_dtype),
        grid=(grid_m,),
        in_specs=[pl.BlockSpec((1, tile_m), lambda i: (0, i))],
        out_specs=pl.BlockSpec((2 * f, tile_m), lambda i: (0, i)),
        compiler_params=pltpu.CompilerParams(
            dimension_semantics=("parallel",)),
    )(t_row)  # (2F, m_pad)

    # Layout plumbing back to the PyTorch-facing (M, 2F) layout.
    return out_t[:, :m].T


class FixedTimeEncoder:
    """JAX/Pallas re-implementation of the PyTorch FixedTimeEncoder."""

    def __init__(self, max_num_frames: int, skip_small_t_freqs: int = 0, *,
                 min_pallas_elems: int = 8192, out_dtype=jnp.float32):
        assert max_num_frames >= 1, f"Wrong max_num_frames: {max_num_frames}"
        self.fourier_coefs_np = construct_log_spaced_freqs(
            max_num_frames, skip_small_t_freqs)          # (1, F) numpy
        self.fourier_coefs = jnp.asarray(self.fourier_coefs_np)
        self.min_pallas_elems = min_pallas_elems
        self.out_dtype = out_dtype

    def get_dim(self) -> int:
        return self.fourier_coefs.shape[1] * 2

    def __call__(self, t: jax.Array) -> jax.Array:
        assert t.ndim == 2, f"Wrong shape: {t.shape}"
        m = t.shape[0] * t.shape[1]
        t_flat = t.reshape(-1).astype(jnp.float32)

        if m < self.min_pallas_elems:
            # Tiny-M fast path: pallas_call launch overhead dwarfs the work,
            # let XLA fuse the elementwise math instead.
            raw = t_flat[:, None] * self.fourier_coefs
            return jnp.concatenate(
                [jnp.sin(raw), jnp.cos(raw)], axis=1).astype(self.out_dtype)

        return fixed_time_encode_pallas(
            t_flat, self.fourier_coefs_np, out_dtype=self.out_dtype)


def _reference(t, coefs):
    t_flat = np.asarray(t, dtype=np.float32).reshape(-1)
    raw = np.asarray(coefs, dtype=np.float32) * t_flat[:, None]
    return np.concatenate([np.sin(raw), np.cos(raw)], axis=1)


if __name__ == "__main__":
    key = jax.random.PRNGKey(0)
    max_num_frames = 16                      # -> time_resolution=16, F=4, out dim=8

    # Force the Pallas path even at demo-sized M so the kernel is exercised.
    enc = FixedTimeEncoder(max_num_frames, min_pallas_elems=0)

    # t: (batch=2, seq=8) of frame indices, as in the original usage.
    t = jax.random.randint(key, (2, 8), 0, max_num_frames).astype(jnp.float32)
    out = jax.block_until_ready(enc(t))
    expected = _reference(np.asarray(t), enc.fourier_coefs_np)
    assert out.shape == (16, enc.get_dim()), out.shape
    np.testing.assert_allclose(np.asarray(out), expected, rtol=1e-5, atol=1e-5)

    # Second check: non-multiple-of-128 M with a small tile to exercise
    # padding and a multi-step grid (grid_m > 1).
    key2 = jax.random.PRNGKey(0)
    t2 = jax.random.randint(key2, (4, 300), 0, max_num_frames).astype(jnp.float32)
    out2 = jax.block_until_ready(
        fixed_time_encode_pallas(t2.reshape(-1), enc.fourier_coefs_np,
                                 tile_m_max=128))
    expected2 = _reference(np.asarray(t2), enc.fourier_coefs_np)
    assert out2.shape == (1200, enc.get_dim()), out2.shape
    np.testing.assert_allclose(np.asarray(out2), expected2, rtol=1e-5, atol=1e-5)

    print("KERNEL_OK")
</pallas_src>

<mosaic_0001>
module attributes {stable_mosaic.version = 11 : i64} {
  func.func @kernel(%arg0: i32, %arg1: memref<1x128xf32, #tpu.memory_space<vmem>>, %arg2: memref<8x128xf32, #tpu.memory_space<vmem>>) attributes {dimension_semantics = [#tpu.dimension_semantics<parallel>], iteration_bounds = array<i64: 1>, scalar_prefetch = 0 : i64, scratch_operands = 0 : i64, tpu.core_type = #tpu.core_type<tc>, window_params = [{transform_indices = @transform_0, window_bounds = array<i64: 1, 128>}, {transform_indices = @transform_1, window_bounds = array<i64: 8, 128>}]} {
    %c0 = arith.constant 0 : index
    %c0_0 = arith.constant 0 : index
    %0 = vector.load %arg1[%c0, %c0_0] : memref<1x128xf32, #tpu.memory_space<vmem>>, vector<1x128xf32>
    %cst = arith.constant 0.196349546 : f32
    %1 = vector.broadcast %cst : f32 to vector<1x128xf32>
    %2 = arith.mulf %0, %1 : vector<1x128xf32>
    %3 = math.sin %2 : vector<1x128xf32>
    %c0_1 = arith.constant 0 : index
    %c0_2 = arith.constant 0 : index
    %4 = vector.load %arg2[%c0_1, %c0_2] : memref<8x128xf32, #tpu.memory_space<vmem>>, vector<1x128xf32>
    tpu.vector_store %arg2[%c0_1, %c0_2], %3 {strides = array<i32>} : memref<8x128xf32, #tpu.memory_space<vmem>>, vector<1x128xf32>,
    %5 = math.cos %2 : vector<1x128xf32>
    %c4 = arith.constant 4 : index
    %c0_3 = arith.constant 0 : index
    %6 = vector.load %arg2[%c4, %c0_3] : memref<8x128xf32, #tpu.memory_space<vmem>>, vector<1x128xf32>
    tpu.vector_store %arg2[%c4, %c0_3], %5 {strides = array<i32>} : memref<8x128xf32, #tpu.memory_space<vmem>>, vector<1x128xf32>,
    %cst_4 = arith.constant 0.392699093 : f32
    %7 = vector.broadcast %cst_4 : f32 to vector<1x128xf32>
    %8 = arith.mulf %0, %7 : vector<1x128xf32>
    %9 = math.sin %8 : vector<1x128xf32>
    %c1 = arith.constant 1 : index
    %c0_5 = arith.constant 0 : index
    %10 = vector.load %arg2[%c1, %c0_5] : memref<8x128xf32, #tpu.memory_space<vmem>>, vector<1x128xf32>
    tpu.vector_store %arg2[%c1, %c0_5], %9 {strides = array<i32>} : memref<8x128xf32, #tpu.memory_space<vmem>>, vector<1x128xf32>,
    %11 = math.cos %8 : vector<1x128xf32>
    %c5 = arith.constant 5 : index
    %c0_6 = arith.constant 0 : index
    %12 = vector.load %arg2[%c5, %c0_6] : memref<8x128xf32, #tpu.memory_space<vmem>>, vector<1x128xf32>
    tpu.vector_store %arg2[%c5, %c0_6], %11 {strides = array<i32>} : memref<8x128xf32, #tpu.memory_space<vmem>>, vector<1x128xf32>,
    %cst_7 = arith.constant 0.785398185 : f32
    %13 = vector.broadcast %cst_7 : f32 to vector<1x128xf32>
    %14 = arith.mulf %0, %13 : vector<1x128xf32>
    %15 = math.sin %14 : vector<1x128xf32>
    %c2 = arith.constant 2 : index
    %c0_8 = arith.constant 0 : index
    %16 = vector.load %arg2[%c2, %c0_8] : memref<8x128xf32, #tpu.memory_space<vmem>>, vector<1x128xf32>
    tpu.vector_store %arg2[%c2, %c0_8], %15 {strides = array<i32>} : memref<8x128xf32, #tpu.memory_space<vmem>>, vector<1x128xf32>,
    %17 = math.cos %14 : vector<1x128xf32>
    %c6 = arith.constant 6 : index
    %c0_9 = arith.constant 0 : index
    %18 = vector.load %arg2[%c6, %c0_9] : memref<8x128xf32, #tpu.memory_space<vmem>>, vector<1x128xf32>
    tpu.vector_store %arg2[%c6, %c0_9], %17 {strides = array<i32>} : memref<8x128xf32, #tpu.memory_space<vmem>>, vector<1x128xf32>,
    %cst_10 = arith.constant 1.57079637 : f32
    %19 = vector.broadcast %cst_10 : f32 to vector<1x128xf32>
    %20 = arith.mulf %0, %19 : vector<1x128xf32>
    %21 = math.sin %20 : vector<1x128xf32>
    %c3 = arith.constant 3 : index
    %c0_11 = arith.constant 0 : index
    %22 = vector.load %arg2[%c3, %c0_11] : memref<8x128xf32, #tpu.memory_space<vmem>>, vector<1x128xf32>
    tpu.vector_store %arg2[%c3, %c0_11], %21 {strides = array<i32>} : memref<8x128xf32, #tpu.memory_space<vmem>>, vector<1x128xf32>,
    %23 = math.cos %20 : vector<1x128xf32>
    %c7 = arith.constant 7 : index
    %c0_12 = arith.constant 0 : index
    %24 = vector.load %arg2[%c7, %c0_12] : memref<8x128xf32, #tpu.memory_space<vmem>>, vector<1x128xf32>
    tpu.vector_store %arg2[%c7, %c0_12], %23 {strides = array<i32>} : memref<8x128xf32, #tpu.memory_space<vmem>>, vector<1x128xf32>,
    return
  }
  func.func @transform_0(%arg0: i32) -> (i32, i32) {
    %c0_i32 = arith.constant 0 : i32
    %c0_i32_0 = arith.constant 0 : i32
    return %c0_i32, %arg0 : i32, i32
  }
  func.func @transform_1(%arg0: i32) -> (i32, i32) {
    %c0_i32 = arith.constant 0 : i32
    %c0_i32_0 = arith.constant 0 : i32
    return %c0_i32, %arg0 : i32, i32
  }
}

</mosaic_0001>

<bundles_post_ra>
// kernel: tpu_custom_call.1
= control target key start
LH: loop header
LB: loop body
LE: loop exit
PB: predicated region body
PF: predicated region fallthrough
CT: control target
= control target key end

     0   :  { %6 = vsyncpa [#allocation3], 0  ;;  %s1839_s0 = inlined_call_operand.hbm [shape: f32[1,128], index: 0, kind: input, shape index: {}]   ;;  %s1840_s1 = inlined_call_operand.hbm [shape: f32[8,128], index: 1, kind: output, shape index: {}]  }
   0x1   :  { %7 = vsyncpa [#allocation4], 0  ;;  %s13_s8 = sshll.u32 %s1839_s0, 4  ;;  %s1374_s9 = smov [#allocation2]   ;;  %s14_s8 = int_to_ptr.hbm [resolvable:$true] %s13_s8 }
   0x2   :  { %s15_s10 = sshll.u32 %s1374_s9, 4  ;;  %s16_s10 = int_to_ptr.vmem [resolvable:$true] %s15_s10 }
   0x3   :  { %18 = dma.hbm_to_vmem [thread:$0]  %s14_s8, 16, %s16_s10, [#allocation3]  }
   0x4   :  { %1370 = dma.done.wait [#allocation3], 16  }
   0x5   :  { %1371 = vsyncadd [#allocation3], 4294967280  ;;  %v1396_v0 = vld [vmem:[#allocation2] sm:$0x1]  ;;  %v1375_v28 = vmov 683565275  }
   0x6   :  { %v1399_v1 = vmul.f32 0.19634955, %v1396_v0  ;;  %v1402_v2 = vmul.f32 0.3926991, %v1396_v0  ;;  %v1405_v3 = vmul.f32 0.7853982, %v1396_v0 }
   0x7   :  { %v1376_v30 = vmov 2475754826   ;;  %v1377_v32 = vmov 2131351028   ;;  %v1378_v34 = vmov 2102212464  }
   0x8   :  { %v25_v4 = vand.u32 2147483647, %v1399_v1  ;;  %v28_v5 = vand.u32 2139095040, %v1399_v1  ;;  %v337_v6 = vand.u32 2147483647, %v1402_v2  ;;  %v340_v7 = vand.u32 2139095040, %v1402_v2 }
   0x9   :  { %v652_v11 = vand.u32 2139095040, %v1405_v3  ;;  %v1379_v36 = vmov 920167782   ;;  %v1380_v45 = vmov 1326507024   ;;  %s1382_s0 = smov [#allocation5]  }
   0xa   :  { %v29_v8 = vshrl.u32 %v28_v5, 23  ;;  %v32_v9 = vand.u32 8388607, %v25_v4  ;;  %v341_v10 = vshrl.u32 %v340_v7, 23  ;;  %v344_v15 = vand.u32 8388607, %v337_v6 }
   0xb   :  { %v653_v18 = vshrl.u32 %v652_v11, 23  ;;  %s1277_s11 = sshll.u32 %s1382_s0, 4  ;;  %s1279_s14 = sshll.u32 %s1840_s1, 4  ;;  %s1278_s11 = int_to_ptr.vmem [resolvable:$true] %s1277_s11  ;;  %s1280_s14 = int_to_ptr.hbm [resolvable:$true] %s1279_s14 }
   0xc   :  { %v1289_v12 = vadd.s32 4294967169, %v29_v8  ;;  %v33_v13 = vor.u32 8388608, %v32_v9  ;;  %v1295_v14 = vadd.s32 4294967169, %v341_v10  ;;  %v345_v21 = vor.u32 8388608, %v344_v15 }
   0xd   :  { %v1422_v26 = vadd.s32 4294967169, %v653_v18 }
   0xe   :  { %v35_v16 = vadd.s32 1, %v1289_v12  ;;  %v347_v17 = vadd.s32 1, %v1295_v14  ;;  %v1416_v20 = vshll.u32 %v33_v13, 8  ;;  %v1430_v39 = vshll.u32 %v345_v21, 8 }
  0x10   :  { %vm36_vm0 = vcmp.gt.s32.totalorder %v35_v16, 0  ;;  %vm348_vm1 = vcmp.gt.s32.totalorder %v347_v17, 0  ;;  %v74_v38 = vand.u32 65535, %v1416_v20  ;;  %v75_v43 = vshrl.u32 %v1416_v20, 16 }
  0x11   :  { %v37_v19 = vsel %vm36_vm0, %v35_v16, 0  ;;  %v349_v23 = vsel %vm348_vm1, %v347_v17, 0 }
  0x12   :  { %v39_v22 = vand.u32 31, %v37_v19  ;;  %v1418_v24 = vshrl.u32 %v37_v19, 5  ;;  %v1420_v25 = vand.u32 31, %v349_v23  ;;  %v1450_v56 = vshrl.u32 %v349_v23, 5 }
  0x14   :  { %v40_v27 = vsub.s32 32, %v39_v22  ;;  %v42_v29 = vshll.u32 %v1375_v28, %v39_v22  ;;  %v45_v31 = vshll.u32 %v1376_v30, %v39_v22  ;;  %v48_v33 = vshll.u32 %v1377_v32, %v39_v22 }
  0x15   :  { %v51_v35 = vshll.u32 %v1378_v34, %v39_v22  ;;  %v54_v37 = vshll.u32 %v1379_v36, %v39_v22  ;;  %vm57_vm2 = vcmp.lt.s32.totalorder %v1418_v24, 1  ;;  %vm60_vm3 = vcmp.lt.s32.totalorder %v1418_v24, 4 }
  0x16   :  { %v43_v40 = vshrl.u32 %v1376_v30, %v40_v27  ;;  %v46_v41 = vshrl.u32 %v1377_v32, %v40_v27  ;;  %v49_v42 = vshrl.u32 %v1378_v34, %v40_v27  ;;  %v52_v44 = vshrl.u32 %v1379_v36, %v40_v27 }
  0x17   :  { %v55_v46 = vshrl.u32 %v1380_v45, %v40_v27  ;;  %v1441_v50 = vsub.s32 32, %v1420_v25  ;;  %v41_v51 = vshrl.u32 %v1375_v28, %v40_v27  ;;  %vm59_vm4 = vcmp.lt.s32.totalorder %v1418_v24, 3 }
  0x18   :  { %v44_v47 = vor.u32 %v43_v40, %v42_v29  ;;  %v47_v48 = vor.u32 %v46_v41, %v45_v31  ;;  %v50_v49 = vor.u32 %v49_v42, %v48_v33  ;;  %v53_v52 = vor.u32 %v52_v44, %v51_v35 }
  0x19   :  { %v56_v53 = vor.u32 %v55_v46, %v54_v37  ;;  %vm58_vm5 = vcmp.lt.s32.totalorder %v1418_v24, 2  ;;  %v354_v59 = vshll.u32 %v1375_v28, %v1420_v25  ;;  %v357_v60 = vshll.u32 %v1376_v30, %v1420_v25 }
  0x1a   :  { %v65_v54 = vsel %vm57_vm2, %v44_v47, %v47_v48  ;;  %v69_v55 = vsel %vm57_vm2, %v47_v48, %v50_v49  ;;  %v66_v57 = vsel %vm60_vm3, %v53_v52, 920167782  ;;  %v62_v61 = vsel %vm60_vm3, %v50_v49, 2102212464 }
  0x1b   :  { %v70_v58 = vsel %vm60_vm3, %v56_v53, 1326507024  ;;  %v67_v62 = vsel %vm59_vm4, %v50_v49, %v66_v57  ;;  %v355_v5 = vshrl.u32 %v1376_v30, %v1441_v50  ;;  %v61_v7 = vsel %vm57_vm2, %v41_v51, %v44_v47 }
  0x1c   :  { %v71_v63 = vsel %vm59_vm4, %v53_v52, %v70_v58  ;;  %v68_v8 = vsel %vm58_vm5, %v65_v54, %v67_v62  ;;  %v358_v10 = vshrl.u32 %v1377_v32, %v1441_v50  ;;  %v63_v15 = vsel %vm59_vm4, %v47_v48, %v62_v61 }
  0x1d   :  { %v72_v9 = vsel %vm58_vm5, %v69_v55, %v71_v63  ;;  %v98_v13 = vand.u32 65535, %v68_v8  ;;  %v99_v14 = vshrl.u32 %v68_v8, 16  ;;  %v1478_v16 = vor.u32 %v355_v5, %v354_v59 }
  0x1e   :  { %v76_v11 = vand.u32 65535, %v72_v9  ;;  %v77_v12 = vshrl.u32 %v72_v9, 16  ;;  %v1480_v17 = vor.u32 %v358_v10, %v357_v60  ;;  %v360_v18 = vshll.u32 %v1377_v32, %v1420_v25 }
  0x1f   :  { %v361_v23 = vshrl.u32 %v1378_v34, %v1441_v50  ;;  %v100_v29 = vmul.u32 %v98_v13, %v74_v38  ;;  %v101_v31 = vmul.u32 %v99_v14, %v74_v38  ;;  %v102_v33 = vmul.u32 %v98_v13, %v75_v43 }
  0x20   :  { %v78_v19 = vmul.u32 %v76_v11, %v74_v38  ;;  %v79_v21 = vmul.u32 %v77_v12, %v74_v38  ;;  %v80_v22 = vmul.u32 %v76_v11, %v75_v43  ;;  %v81_v27 = vmul.u32 %v77_v12, %v75_v43 }
  0x21   :  { %v103_v41 = vmul.u32 %v99_v14, %v75_v43  ;;  %v104_v44 = vshll.u32 %v101_v31, 16  ;;  %v105_v46 = vshrl.u32 %v101_v31, 16  ;;  %v106_v47 = vshll.u32 %v102_v33, 16 }
  0x22   :  { %v82_v35 = vshll.u32 %v79_v21, 16  ;;  %v83_v37 = vshrl.u32 %v79_v21, 16  ;;  %v84_v40 = vshll.u32 %v80_v22, 16  ;;  %v85_v42 = vshrl.u32 %v80_v22, 16 }
  0x23   :  { %v107_v49 = vshrl.u32 %v102_v33, 16  ;;  %v363_v51 = vshll.u32 %v1378_v34, %v1420_v25  ;;  %v1381_v52 = vmov 0   ;;  %vm108_vm7 = vc.u32 %v100_v29, %v104_v44 }
  0x24   :  { %vm86_vm6 = vc.u32 %v78_v19, %v82_v35  ;;  %v88_v48 = vadd.s32 %v82_v35, %v78_v19  ;;  %v110_v38 = vadd.s32 %v104_v44, %v100_v29  ;;  %v364_v54 = vshrl.u32 %v1379_v36, %v1441_v50 }
  0x25   :  { %v87_v53 = vsel %vm86_vm6, 1, %v1381_v52  ;;  %v109_v43 = vsel %vm108_vm7, 1, %v1381_v52  ;;  %v366_v57 = vshll.u32 %v1379_v36, %v1420_v25  ;;  %v362_v60 = vor.u32 %v361_v23, %v360_v18 }
  0x26   :  { %v89_v55 = vadd.s32 %v87_v53, %v81_v27  ;;  %vm90_vm8 = vc.u32 %v88_v48, %v84_v40  ;;  %v111_v59 = vadd.s32 %v109_v43, %v103_v41  ;;  %vm112_vm9 = vc.u32 %v110_v38, %v106_v47 }
  0x27   :  { %v91_v58 = vsel %vm90_vm8, 1, %v1381_v52  ;;  %v113_v62 = vsel %vm112_vm9, 1, %v1381_v52  ;;  %v365_v63 = vor.u32 %v364_v54, %v363_v51  ;;  %v367_v5 = vshrl.u32 %v1380_v45, %v1441_v50 }
  0x28   :  { %v93_v61 = vadd.s32 %v91_v58, %v89_v55  ;;  %v1498_v8 = vadd.s32 %v110_v38, %v106_v47  ;;  %v115_v9 = vadd.s32 %v113_v62, %v111_v59  ;;  %vm369_vm10 = vcmp.lt.s32.totalorder %v1450_v56, 1 }
  0x29   :  { %vm371_vm11 = vcmp.lt.s32.totalorder %v1450_v56, 3  ;;  %v368_v10 = vor.u32 %v367_v5, %v366_v57  ;;  %vm370_vm12 = vcmp.lt.s32.totalorder %v1450_v56, 2  ;;  %vm372_vm13 = vcmp.lt.s32.totalorder %v1450_v56, 4 }
  0x2a   :  { %v94_v25 = vadd.s32 %v93_v61, %v83_v37  ;;  %v64_v11 = vsel %vm58_vm5, %v61_v7, %v63_v15  ;;  %v116_v12 = vadd.s32 %v115_v9, %v105_v46  ;;  %v377_v13 = vsel %vm369_vm10, %v1478_v16, %v1480_v17 }
  0x2b   :  { %v378_v14 = vsel %vm372_vm13, %v365_v63, 920167782  ;;  %v381_v21 = vsel %vm369_vm10, %v1480_v17, %v362_v60  ;;  %v386_v24 = vand.u32 65535, %v1430_v39  ;;  %v382_v22 = vsel %vm372_vm13, %v368_v10, 1326507024 }
  0x2c   :  { %v1512_v18 = vadd.s32 %v94_v25, %v85_v42  ;;  %v379_v19 = vsel %vm371_vm11, %v362_v60, %v378_v14  ;;  %v117_v7 = vadd.s32 %v116_v12, %v107_v49  ;;  %v387_v23 = vshrl.u32 %v1430_v39, 16 }
  0x2d   :  { %v380_v15 = vsel %vm370_vm12, %v377_v13, %v379_v19  ;;  %v118_v27 = vmul.u32 %v1416_v20, %v64_v11  ;;  %v383_v29 = vsel %vm371_vm11, %v365_v63, %v382_v22  ;;  %v659_v40 = vadd.s32 1, %v1422_v26 }
  0x2e   :  { %vm120_vm14 = vc.u32 %v1512_v18, %v1498_v8  ;;  %v410_v31 = vand.u32 65535, %v380_v15  ;;  %v121_v33 = vadd.s32 1, %v117_v7  ;;  %v384_v35 = vsel %vm370_vm12, %v381_v21, %v383_v29 }
  0x2f   :  { %v411_v37 = vshrl.u32 %v380_v15, 16  ;;  %v353_v41 = vshrl.u32 %v1375_v28, %v1441_v50  ;;  %v374_v20 = vsel %vm372_vm13, %v362_v60, 2102212464  ;;  %v388_v42 = vand.u32 65535, %v384_v35 }
  0x30   :  { %v389_v44 = vshrl.u32 %v384_v35, 16  ;;  %v122_v46 = vsel %vm120_vm14, %v121_v33, %v117_v7  ;;  %v412_v47 = vmul.u32 %v410_v31, %v386_v24  ;;  %v414_v49 = vmul.u32 %v410_v31, %v387_v23 }
  0x31   :  { %v413_v48 = vmul.u32 %v411_v37, %v386_v24  ;;  %v123_v51 = vadd.s32 %v122_v46, %v118_v27  ;;  %v390_v53 = vmul.u32 %v388_v42, %v386_v24  ;;  %v392_v54 = vmul.u32 %v388_v42, %v387_v23 }
  0x32   :  { %v391_v38 = vmul.u32 %v389_v44, %v386_v24  ;;  %vm660_vm15 = vcmp.gt.s32.totalorder %v659_v40, 0  ;;  %v373_v26 = vsel %vm369_vm10, %v353_v41, %v1478_v16  ;;  %v393_v50 = vmul.u32 %v389_v44, %v387_v23 }
  0x33   :  { %v416_v55 = vshll.u32 %v413_v48, 16  ;;  %v124_v43 = vadd.s32 536870912, %v123_v51  ;;  %v375_v58 = vsel %vm371_vm11, %v1480_v17, %v374_v20  ;;  %v396_v59 = vshll.u32 %v392_v54, 16 }
  0x34   :  { %v394_v57 = vshll.u32 %v391_v38, 16  ;;  %v415_v60 = vmul.u32 %v411_v37, %v387_v23  ;;  %v418_v61 = vshll.u32 %v414_v49, 16  ;;  %v661_v16 = vsel %vm660_vm15, %v659_v40, 0 }
  0x35   :  { %v1543_v62 = vshrl.u32 %v124_v43, 30  ;;  %vm420_vm1 = vc.u32 %v412_v47, %v416_v55  ;;  %v422_v25 = vadd.s32 %v416_v55, %v412_v47  ;;  %v395_v11 = vshrl.u32 %v391_v38, 16 }
  0x36   :  { %vm398_vm0 = vc.u32 %v390_v53, %v394_v57  ;;  %v400_v63 = vadd.s32 %v394_v57, %v390_v53  ;;  %v421_v9 = vsel %vm420_vm1, 1, %v1381_v52  ;;  %v417_v13 = vshrl.u32 %v413_v48, 16 }
  0x37   :  { %v399_v5 = vsel %vm398_vm0, 1, %v1381_v52  ;;  %v126_v10 = vshll.u32 %v1543_v62, 30  ;;  %v423_v14 = vadd.s32 %v421_v9, %v415_v60  ;;  %vm424_vm3 = vc.u32 %v422_v25, %v418_v61 }
  0x38   :  { %v401_v12 = vadd.s32 %v399_v5, %v393_v50  ;;  %vm402_vm2 = vc.u32 %v400_v63, %v396_v59  ;;  %v397_v21 = vshrl.u32 %v392_v54, 16  ;;  %v425_v7 = vsel %vm424_vm3, 1, %v1381_v52 }
  0x39   :  { %v403_v17 = vsel %vm402_vm2, 1, %v1381_v52  ;;  %v127_v19 = vsub.s32 %v123_v51, %v126_v10  ;;  %v419_v15 = vshrl.u32 %v414_v49, 16  ;;  %v427_v22 = vadd.s32 %v425_v7, %v423_v14 }
  0x3a   :  { %v405_v24 = vadd.s32 %v403_v17, %v401_v12  ;;  %v663_v23 = vand.u32 31, %v661_v16  ;;  %v1551_v31 = vadd.s32 %v422_v25, %v418_v61  ;;  %v376_v33 = vsel %vm370_vm12, %v373_v26, %v375_v58 }
  0x3b   :  { %vm128_vm4 = vcmp.lt.s32.totalorder %v127_v19, 0  ;;  %v129_v27 = vsub.s32 0, %v127_v19  ;;  %v428_v35 = vadd.s32 %v427_v22, %v417_v13  ;;  %v649_v44 = vand.u32 2147483647, %v1405_v3 }
  0x3c   :  { %v406_v29 = vadd.s32 %v405_v24, %v395_v11  ;;  %v1557_v41 = vsub.s32 32, %v663_v23  ;;  %v119_v46 = vadd.s32 %v1498_v8, %v1512_v18  ;;  %v430_v47 = vmul.u32 %v1430_v39, %v376_v33 }
  0x3d   :  { %v130_v37 = vsel %vm128_vm4, %v129_v27, %v127_v19  ;;  %v429_v42 = vadd.s32 %v428_v35, %v419_v15  ;;  %v1565_v56 = vshrl.u32 %v661_v16, 5  ;;  %v149_v49 = vsub.s32 4, %v1543_v62 }
  0x3e   :  { %v1555_v40 = vadd.s32 %v406_v29, %v397_v21  ;;  %v131_v20 = vclz %v130_v37  ;;  %v666_v53 = vshll.u32 %v1375_v28, %v663_v23  ;;  %v667_v38 = vshrl.u32 %v1376_v30, %v1557_v41 }
  0x3f   :  { %v433_v51 = vadd.s32 1, %v429_v42  ;;  %v669_v54 = vshll.u32 %v1376_v30, %v663_v23  ;;  %v672_v8 = vshll.u32 %v1377_v32, %v663_v23  ;;  %v675_v39 = vshll.u32 %v1378_v34, %v663_v23 }
  0x40   :  { %vm432_vm5 = vc.u32 %v1555_v40, %v1551_v31  ;;  %v1290_v48 = vadd.s32 4294967294, %v131_v20  ;;  %v670_v55 = vshrl.u32 %v1377_v32, %v1557_v41  ;;  %v676_v43 = vshrl.u32 %v1379_v36, %v1557_v41 }
  0x41   :  { %v434_v18 = vsel %vm432_vm5, %v433_v51, %v429_v42  ;;  %v673_v57 = vshrl.u32 %v1378_v34, %v1557_v41  ;;  %v678_v58 = vshll.u32 %v1379_v36, %v663_v23  ;;  %v679_v63 = vshrl.u32 %v1380_v45, %v1557_v41 }
  0x42   :  { %vm1291_vm6 = vcmp.lt.s32.totalorder %v1290_v48, 0  ;;  %v435_v50 = vadd.s32 %v434_v18, %v430_v47  ;;  %vm27_vm7 = vcmp.lt.s32.totalorder %v1399_v1, 0  ;;  %v656_v5 = vand.u32 8388607, %v649_v44 }
  0x43   :  { %v134_v26 = vsel %vm1291_vm6, 0, %v1290_v48  ;;  %v150_v16 = vsel %vm27_vm7, %v149_v49, %v1543_v62  ;;  %v677_v10 = vor.u32 %v676_v43, %v675_v39  ;;  %v668_v12 = vor.u32 %v667_v38, %v666_v53 }
  0x44   :  { %v135_v59 = vsub.s32 32, %v134_v26  ;;  %v136_v60 = vshll.u32 %v127_v19, %v134_v26  ;;  %v139_v61 = vsub.s32 4294967266, %v134_v26  ;;  %v436_v11 = vadd.s32 536870912, %v435_v50 }
  0x45   :  { %v671_v17 = vor.u32 %v670_v55, %v669_v54  ;;  %v674_v13 = vor.u32 %v673_v57, %v672_v8  ;;  %v680_v21 = vor.u32 %v679_v63, %v678_v58  ;;  %vm684_vm8 = vcmp.lt.s32.totalorder %v1565_v56, 4 }
  0x46   :  { %v137_v9 = vshrl.u32 %v119_v46, %v135_v59  ;;  %v140_v25 = vadd.s32 127, %v139_v61  ;;  %vm1592_vm9 = vcmp.le.f32.partialorder %v25_v4, 0.7853982  ;;  %v1596_v7 = vshrl.u32 %v436_v11, 30 }
  0x47   :  { %v657_v15 = vor.u32 8388608, %v656_v5  ;;  %vm681_vm10 = vcmp.lt.s32.totalorder %v1565_v56, 1  ;;  %vm683_vm11 = vcmp.lt.s32.totalorder %v1565_v56, 3  ;;  %v690_v23 = vsel %vm684_vm8, %v677_v10, 920167782 }
  0x48   :  { %v138_v14 = vor.u32 %v137_v9, %v136_v60  ;;  %v141_v19 = vshll.u32 %v140_v25, 23  ;;  %v152_v27 = vsel %vm1592_vm9, 0, %v150_v16  ;;  %v438_v4 = vshll.u32 %v1596_v7, 30 }
  0x49   :  { %vm682_vm12 = vcmp.lt.s32.totalorder %v1565_v56, 2  ;;  %v689_v33 = vsel %vm681_vm10, %v668_v12, %v671_v17  ;;  %v693_v35 = vsel %vm681_vm10, %v671_v17, %v674_v13  ;;  %v694_v37 = vsel %vm684_vm8, %v680_v21, 1326507024 }
  0x4a   :  { %v142_v62 = vor.u32 4788187, %v141_v19  ;;  %v145_v22 = vcvt.s32.f32 %v138_v14  ;;  %v1612_v20 = vsub.s32 %v435_v50, %v438_v4  ;;  %v691_v42 = vsel %vm683_vm11, %v674_v13, %v690_v23 }
  0x4b   :  { %v695_v46 = vsel %vm683_vm11, %v677_v10, %v694_v37  ;;  %v1618_v47 = vshll.u32 %v657_v15, 8  ;;  %v169_v51 = vadd.s32 3, %v152_v27  ;;  %v1627_v8 = vsel %vm682_vm12, %v689_v33, %v691_v42 }
  0x4c   :  { %v143_v29 = vand.u32 2147483647, %v142_v62  ;;  %v696_v49 = vsel %vm682_vm12, %v693_v35, %v695_v46  ;;  %vm440_vm13 = vcmp.lt.s32.totalorder %v1612_v20, 0  ;;  %v441_v53 = vsub.s32 0, %v1612_v20 }
  0x4d   :  { %v698_v38 = vand.u32 65535, %v1618_v47  ;;  %v700_v39 = vand.u32 65535, %v696_v49  ;;  %v701_v18 = vshrl.u32 %v696_v49, 16  ;;  %v431_v55 = vadd.s32 %v1551_v31, %v1555_v40 }
  0x4e   :  { %v146_v48 = vmul.f32 %v145_v22, %v143_v29  ;;  %v442_v43 = vsel %vm440_vm13, %v441_v53, %v1612_v20  ;;  %v665_v26 = vshrl.u32 %v1375_v28, %v1557_v41  ;;  %v699_v50 = vshrl.u32 %v1618_v47, 16 }
  0x4f   :  { %v443_v58 = vclz %v442_v43  ;;  %v686_v59 = vsel %vm684_vm8, %v674_v13, 2102212464  ;;  %v1639_v60 = vmul.u32 %v701_v18, %v698_v38  ;;  %v1646_v40 = vand.u32 3, %v169_v51 }
  0x50   :  { %v147_v54 = vxor.u32 2147483648, %v146_v48  ;;  %v702_v61 = vmul.u32 %v700_v39, %v698_v38  ;;  %v723_v41 = vshrl.u32 %v1627_v8, 16  ;;  %v1651_v5 = vand.u32 3, %v152_v27 }
  0x51   :  { %vm339_vm14 = vcmp.lt.s32.totalorder %v1402_v2, 0  ;;  %v1296_v9 = vadd.s32 4294967294, %v443_v58  ;;  %v706_v25 = vshll.u32 %v1639_v60, 16  ;;  %v461_v16 = vsub.s32 4, %v1596_v7 }
  0x52   :  { %v148_v57 = vsel %vm27_vm7, %v147_v54, %v146_v48  ;;  %v685_v10 = vsel %vm681_vm10, %v665_v26, %v668_v12  ;;  %v687_v11 = vsel %vm683_vm11, %v671_v17, %v686_v59  ;;  %v1660_v13 = vmul.u32 %v700_v39, %v699_v50 }
  0x53   :  { %v1644_v31 = vsel %vm1592_vm9, %v1399_v1, %v148_v57  ;;  %vm1297_vm15 = vcmp.lt.s32.totalorder %v1296_v9, 0  ;;  %v722_v21 = vand.u32 65535, %v1627_v8  ;;  %v705_v15 = vmul.u32 %v701_v18, %v699_v50 }
  0x54   :  { %v153_v63 = vmul.f32 %v1644_v31, %v1644_v31  ;;  %v446_v24 = vsel %vm1297_vm15, 0, %v1296_v9  ;;  %vm710_vm0 = vc.u32 %v702_v61, %v706_v25  ;;  %v1663_v62 = vmul.u32 %v723_v41, %v698_v38 }
  0x55   :  { %v447_v27 = vsub.s32 32, %v446_v24  ;;  %v448_v12 = vshll.u32 %v1612_v20, %v446_v24  ;;  %vm175_vm1 = vcmp.eq.s32.totalorder %v1646_v40, 2  ;;  %vm330_vm2 = vcmp.eq.s32.totalorder %v1651_v5, 2 }
  0x56   :  { %v154_v14 = vmul.f32 -0.001358992, %v153_v63  ;;  %v161_v19 = vmul.f32 -0.00019511016, %v153_v63  ;;  %v451_v17 = vsub.s32 4294967266, %v446_v24  ;;  %v708_v4 = vshll.u32 %v1660_v13, 16 }
  0x57   :  { %v711_v29 = vsel %vm710_vm0, 1, %v1381_v52  ;;  %v712_v33 = vadd.s32 %v706_v25, %v702_v61  ;;  %vm1672_vm3 = vcmp.le.f32.partialorder %v337_v6, 0.7853982  ;;  %v449_v46 = vshrl.u32 %v431_v55, %v447_v27 }
  0x58   :  { %v155_v22 = vadd.f32 0.041655596, %v154_v14  ;;  %v162_v23 = vadd.f32 0.008332121, %v161_v19  ;;  %v1678_v20 = vsel %vm682_vm12, %v685_v10, %v687_v11  ;;  %vm172_vm4 = vcmp.eq.s32.totalorder %v1646_v40, 0 }
  0x59   :  { %vm327_vm5 = vcmp.eq.s32.totalorder %v1651_v5, 0  ;;  %v452_v48 = vadd.s32 127, %v451_v17  ;;  %v713_v49 = vadd.s32 %v711_v29, %v705_v15  ;;  %v724_v51 = vmul.u32 %v722_v21, %v698_v38 }
  0x5a   :  { %v156_v35 = vmul.f32 %v155_v22, %v153_v63  ;;  %v163_v37 = vmul.f32 %v162_v23, %v153_v63  ;;  %v726_v53 = vmul.u32 %v722_v21, %v699_v50  ;;  %vm171_vm6 = vcmp.lt.s32.totalorder %v1646_v40, 2 }
  0x5b   :  { %vm326_vm7 = vcmp.lt.s32.totalorder %v1651_v5, 2  ;;  %v450_v6 = vor.u32 %v449_v46, %v448_v12  ;;  %v728_v39 = vshll.u32 %v1663_v62, 16  ;;  %vm168_vm8 = vweird.f32 %v1399_v1 }
  0x5c   :  { %v157_v54 = vadd.f32 -0.4999988, %v156_v35  ;;  %v164_v8 = vadd.f32 -0.16666654, %v163_v37  ;;  %v453_v56 = vshll.u32 %v452_v48, 23  ;;  %v462_v18 = vsel %vm339_vm14, %v461_v16, %v1596_v7 }
  0x5d   :  { %v707_v55 = vshrl.u32 %v1639_v60, 16  ;;  %vm714_vm9 = vc.u32 %v712_v33, %v708_v4  ;;  %v727_v57 = vmul.u32 %v723_v41, %v699_v50  ;;  %v457_v59 = vcvt.s32.f32 %v450_v6 }
  0x5e   :  { %v158_v38 = vmul.f32 %v157_v54, %v153_v63  ;;  %v165_v43 = vmul.f32 %v164_v8, %v153_v63  ;;  %v715_v26 = vsel %vm714_vm9, 1, %v1381_v52  ;;  %v454_v58 = vor.u32 4788187, %v453_v56 }
  0x5f   :  { %v717_v61 = vadd.s32 %v715_v26, %v713_v49  ;;  %v730_v9 = vshll.u32 %v726_v53, 16  ;;  %v709_v11 = vshrl.u32 %v1660_v13, 16  ;;  %vm732_vm10 = vc.u32 %v724_v51, %v728_v39 }
  0x60   :  { %v159_v25 = vadd.f32 1.0, %v158_v38  ;;  %v166_v10 = vadd.f32 1.0, %v165_v43  ;;  %v455_v14 = vand.u32 2147483647, %v454_v58  ;;  %v733_v7 = vsel %vm732_vm10, 1, %v1381_v52 }
  0x61   :  { %v718_v19 = vadd.s32 %v717_v61, %v707_v55  ;;  %v734_v60 = vadd.s32 %v728_v39, %v724_v51  ;;  %v735_v21 = vadd.s32 %v733_v7, %v727_v57  ;;  %v1695_v50 = vmul.f32 1.5707964, %v1396_v0 }
  0x62   :  { %v167_v16 = vmul.f32 %v166_v10, %v1644_v31  ;;  %v176_v63 = vxor.u32 2147483648, %v159_v25  ;;  %v458_v41 = vmul.f32 %v457_v59, %v455_v14  ;;  %v464_v24 = vsel %vm1672_vm3, 0, %v462_v18 }
  0x63   :  { %v729_v15 = vshrl.u32 %v1663_v62, 16  ;;  %vm736_vm11 = vc.u32 %v734_v60, %v730_v9  ;;  %v1705_v12 = vadd.s32 %v718_v19, %v709_v11  ;;  %v731_v0 = vshrl.u32 %v726_v53, 16 }
  0x64   :  { %v173_v13 = vxor.u32 2147483648, %v167_v16  ;;  %v177_v22 = vsel %vm175_vm1, %v176_v63, %v167_v16  ;;  %v332_v23 = vsel %vm330_vm2, %v176_v63, %v167_v16  ;;  %v737_v31 = vsel %vm736_vm11, 1, %v1381_v52 }
  0x65   :  { %v459_v27 = vxor.u32 2147483648, %v458_v41  ;;  %v739_v17 = vadd.s32 %v737_v31, %v735_v21  ;;  %v1711_v29 = vadd.s32 %v734_v60, %v730_v9  ;;  %v964_v33 = vand.u32 2139095040, %v1695_v50 }
  0x66   :  { %v174_v4 = vsel %vm172_vm4, %v159_v25, %v173_v13  ;;  %v329_v62 = vsel %vm327_vm5, %v159_v25, %v173_v13  ;;  %v481_v8 = vadd.s32 3, %v464_v24  ;;  %v742_v6 = vmul.u32 %v1618_v47, %v1678_v20 }
  0x67   :  { %v178_v35 = vsel %vm171_vm6, %v174_v4, %v177_v22  ;;  %v333_v37 = vsel %vm326_vm7, %v329_v62, %v332_v23  ;;  %v460_v46 = vsel %vm339_vm14, %v459_v27, %v458_v41  ;;  %v740_v48 = vadd.s32 %v739_v17, %v729_v15 }
  0x68   :  { %v179_v49 = vsel %vm168_vm8, nan, %v178_v35  ;;  %v334_v51 = vsel %vm168_vm8, nan, %v333_v37  ;;  %v463_v53 = vsel %vm1672_vm3, %v1402_v2, %v460_v46  ;;  %v965_v54 = vshrl.u32 %v964_v33, 23 }
  0x69   :  { %180 = vst [vmem:[#allocation5] sm:$0x1] %v179_v49  ;;  %v465_v40 = vmul.f32 %v463_v53, %v463_v53  ;;  %v741_v5 = vadd.s32 %v740_v48, %v731_v0  ;;  %vm744_vm12 = vc.u32 %v1705_v12, %v1711_v29  ;;  %v482_v43 = vand.u32 3, %v481_v8 }
  0x6a   :  { %335 = vst [vmem:[#allocation5 + $0x4] sm:$0x1] %v334_v51  ;;  %v1307_v39 = vadd.s32 4294967169, %v965_v54  ;;  %v637_v57 = vand.u32 3, %v464_v24  ;;  %v961_v9 = vand.u32 2147483647, %v1695_v50  ;;  %vm480_vm15 = vweird.f32 %v1402_v2 }
  0x6b   :  { %v466_v56 = vmul.f32 -0.001358992, %v465_v40  ;;  %v473_v1 = vmul.f32 -0.00019511016, %v465_v40  ;;  %v745_v18 = vadd.s32 1, %v741_v5  ;;  %vm483_vm14 = vcmp.lt.s32.totalorder %v482_v43, 2 }
  0x6c   :  { %v971_v55 = vadd.s32 1, %v1307_v39  ;;  %vm484_vm0 = vcmp.eq.s32.totalorder %v482_v43, 0  ;;  %vm487_vm1 = vcmp.eq.s32.totalorder %v482_v43, 2  ;;  %vm642_vm2 = vcmp.eq.s32.totalorder %v637_v57, 2 }
  0x6d   :  { %v467_v38 = vadd.f32 0.041655596, %v466_v56  ;;  %v474_v42 = vadd.f32 0.008332121, %v473_v1  ;;  %v746_v26 = vsel %vm744_vm12, %v745_v18, %v741_v5  ;;  %v968_v16 = vand.u32 8388607, %v961_v9 }
  0x6e   :  { %v747_v58 = vadd.s32 %v746_v26, %v742_v6  ;;  %vm972_vm13 = vcmp.gt.s32.totalorder %v971_v55, 0  ;;  %vm638_vm3 = vcmp.lt.s32.totalorder %v637_v57, 2  ;;  %vm639_vm4 = vcmp.eq.s32.totalorder %v637_v57, 0 }
  0x6f   :  { %v468_v59 = vmul.f32 %v467_v38, %v465_v40  ;;  %v475_v61 = vmul.f32 %v474_v42, %v465_v40  ;;  %v973_v47 = vsel %vm972_vm13, %v971_v55, 0  ;;  %v969_v35 = vor.u32 8388608, %v968_v16 }
  0x70   :  { %v748_v20 = vadd.s32 536870912, %v747_v58  ;;  %v975_v25 = vand.u32 31, %v973_v47  ;;  %vm1801_vm11 = vcmp.le.f32.partialorder %v649_v44, 0.7853982  ;;  %vm651_vm12 = vcmp.lt.s32.totalorder %v1405_v3, 0 }
  0x71   :  { %v469_v10 = vadd.f32 -0.4999988, %v468_v59  ;;  %v476_v11 = vadd.f32 -0.16666654, %v475_v61  ;;  %v1775_v38 = vshll.u32 %v969_v35, 8 }
  0x72   :  { %v1733_v14 = vshrl.u32 %v748_v20, 30  ;;  %v1735_v19 = vsub.s32 32, %v975_v25  ;;  %v978_v21 = vshll.u32 %v1375_v28, %v975_v25  ;;  %v981_v41 = vshll.u32 %v1376_v30, %v975_v25 }
  0x73   :  { %v470_v7 = vmul.f32 %v469_v10, %v465_v40  ;;  %v477_v60 = vmul.f32 %v476_v11, %v465_v40  ;;  %v984_v24 = vshll.u32 %v1377_v32, %v975_v25  ;;  %v987_v23 = vshll.u32 %v1378_v34, %v975_v25 }
  0x74   :  { %v750_v63 = vshll.u32 %v1733_v14, 30  ;;  %v979_v22 = vshrl.u32 %v1376_v30, %v1735_v19  ;;  %v982_v27 = vshrl.u32 %v1377_v32, %v1735_v19  ;;  %v985_v0 = vshrl.u32 %v1378_v34, %v1735_v19 }
  0x75   :  { %v471_v15 = vadd.f32 1.0, %v470_v7  ;;  %v478_v13 = vadd.f32 1.0, %v477_v60  ;;  %v988_v17 = vshrl.u32 %v1379_v36, %v1735_v19  ;;  %v1752_v30 = vshrl.u32 %v973_v47, 5 }
  0x76   :  { %v751_v31 = vsub.s32 %v747_v58, %v750_v63  ;;  %v980_v48 = vor.u32 %v979_v22, %v978_v21  ;;  %v1756_v34 = vor.u32 %v982_v27, %v981_v41  ;;  %v986_v51 = vor.u32 %v985_v0, %v984_v24 }
  0x77   :  { %v479_v4 = vmul.f32 %v478_v13, %v463_v53  ;;  %v488_v62 = vxor.u32 2147483648, %v471_v15  ;;  %v989_v54 = vor.u32 %v988_v17, %v987_v23  ;;  %v990_v5 = vshll.u32 %v1379_v36, %v975_v25 }
  0x78   :  { %vm752_vm5 = vcmp.lt.s32.totalorder %v751_v31, 0  ;;  %v753_v33 = vsub.s32 0, %v751_v31  ;;  %v991_v56 = vshrl.u32 %v1380_v45, %v1735_v19  ;;  %vm996_vm6 = vcmp.lt.s32.totalorder %v1752_v30, 4 }
  0x79   :  { %v485_v37 = vxor.u32 2147483648, %v479_v4  ;;  %v489_v46 = vsel %vm487_vm1, %v488_v62, %v479_v4  ;;  %v644_v32 = vsel %vm642_vm2, %v488_v62, %v479_v4  ;;  %vm993_vm7 = vcmp.lt.s32.totalorder %v1752_v30, 1 }
  0x7a   :  { %v754_v49 = vsel %vm752_vm5, %v753_v33, %v751_v31  ;;  %vm995_vm8 = vcmp.lt.s32.totalorder %v1752_v30, 3  ;;  %v743_v36 = vadd.s32 %v1711_v29, %v1705_v12  ;;  %v1002_v45 = vsel %vm996_vm6, %v989_v54, 920167782 }
  0x7b   :  { %v486_v53 = vsel %vm484_vm0, %v471_v15, %v485_v37  ;;  %v641_v40 = vsel %vm639_vm4, %v471_v15, %v485_v37  ;;  %v755_v8 = vclz %v754_v49  ;;  %v992_v43 = vor.u32 %v991_v56, %v990_v5 }
  0x7c   :  { %v490_v6 = vsel %vm483_vm14, %v486_v53, %v489_v46  ;;  %v645_v39 = vsel %vm638_vm3, %v641_v40, %v644_v32  ;;  %vm994_vm10 = vcmp.lt.s32.totalorder %v1752_v30, 2  ;;  %v1001_v2 = vsel %vm993_vm7, %v980_v48, %v1756_v34 }
  0x7d   :  { %v491_v1 = vsel %vm480_vm15, nan, %v490_v6  ;;  %v646_v18 = vsel %vm480_vm15, nan, %v645_v39  ;;  %v1302_v55 = vadd.s32 4294967294, %v755_v8  ;;  %v1003_v12 = vsel %vm995_vm8, %v986_v51, %v1002_v45 }
  0x7e   :  { %492 = vst [vmem:[#allocation5 + $0x1] sm:$0x1] %v491_v1  ;;  %v1005_v61 = vsel %vm993_vm7, %v1756_v34, %v986_v51  ;;  %v1010_v47 = vand.u32 65535, %v1775_v38  ;;  %v773_v20 = vsub.s32 4, %v1733_v14  ;;  %v1004_v25 = vsel %vm994_vm10, %v1001_v2, %v1003_v12 }
  0x7f   :  { %647 = vst [vmem:[#allocation5 + $0x5] sm:$0x1] %v646_v18  ;;  %vm1303_vm9 = vcmp.lt.s32.totalorder %v1302_v55, 0  ;;  %v1006_v10 = vsel %vm996_vm6, %v992_v43, 1326507024  ;;  %v1011_v11 = vshrl.u32 %v1775_v38, 16  ;;  %v977_v21 = vshrl.u32 %v1375_v28, %v1735_v19 }
  0x80   :  { %v758_v42 = vsel %vm1303_vm9, 0, %v1302_v55  ;;  %v1007_v16 = vsel %vm995_vm8, %v989_v54, %v1006_v10  ;;  %v1034_v63 = vand.u32 65535, %v1004_v25  ;;  %v1035_v24 = vshrl.u32 %v1004_v25, 16 }
  0x81   :  { %v759_v26 = vsub.s32 32, %v758_v42  ;;  %v760_v57 = vshll.u32 %v751_v31, %v758_v42  ;;  %v763_v58 = vsub.s32 4294967266, %v758_v42  ;;  %v1008_v41 = vsel %vm994_vm10, %v1005_v61, %v1007_v16 }
  0x82   :  { %v774_v23 = vsel %vm651_vm12, %v773_v20, %v1733_v14  ;;  %v1012_v31 = vand.u32 65535, %v1008_v41  ;;  %v1013_v28 = vshrl.u32 %v1008_v41, 16  ;;  %v1037_v19 = vmul.u32 %v1035_v24, %v1010_v47 }
  0x83   :  { %v761_v29 = vshrl.u32 %v743_v36, %v759_v26  ;;  %v764_v59 = vadd.s32 127, %v763_v58  ;;  %v998_v0 = vsel %vm996_vm6, %v986_v51, 2102212464  ;;  %v1036_v17 = vmul.u32 %v1034_v63, %v1010_v47 }
  0x84   :  { %v1038_v44 = vmul.u32 %v1034_v63, %v1011_v11  ;;  %v997_v4 = vsel %vm993_vm7, %v977_v21, %v980_v48  ;;  %v1014_v62 = vmul.u32 %v1012_v31, %v1010_v47  ;;  %v1015_v33 = vmul.u32 %v1013_v28, %v1010_v47 }
  0x85   :  { %v762_v7 = vor.u32 %v761_v29, %v760_v57  ;;  %v765_v60 = vshll.u32 %v764_v59, 23  ;;  %v1016_v35 = vmul.u32 %v1012_v31, %v1011_v11  ;;  %v1039_v46 = vmul.u32 %v1035_v24, %v1011_v11 }
  0x86   :  { %v1040_v32 = vshll.u32 %v1037_v19, 16  ;;  %v1042_v49 = vshll.u32 %v1038_v44, 16  ;;  %v999_v14 = vsel %vm995_vm8, %v1756_v34, %v998_v0  ;;  %v1017_v54 = vmul.u32 %v1013_v28, %v1011_v11 }
  0x87   :  { %v766_v13 = vor.u32 4788187, %v765_v60  ;;  %v769_v22 = vcvt.s32.f32 %v762_v7  ;;  %v1018_v53 = vshll.u32 %v1015_v33, 16  ;;  %v1020_v40 = vshll.u32 %v1016_v35, 16 }
  0x88   :  { %v1041_v8 = vshrl.u32 %v1037_v19, 16  ;;  %vm1044_vm13 = vc.u32 %v1036_v17, %v1040_v32  ;;  %v1046_v5 = vadd.s32 %v1040_v32, %v1036_v17  ;;  %v1019_v6 = vshrl.u32 %v1015_v33, 16 }
  0x89   :  { %v767_v27 = vand.u32 2147483647, %v766_v13  ;;  %vm1022_vm14 = vc.u32 %v1014_v62, %v1018_v53  ;;  %v1024_v48 = vadd.s32 %v1018_v53, %v1014_v62  ;;  %v1045_v39 = vsel %vm1044_vm13, 1, %v1381_v52 }
  0x8a   :  { %v1023_v1 = vsel %vm1022_vm14, 1, %v1381_v52  ;;  %v1047_v18 = vadd.s32 %v1045_v39, %v1039_v46  ;;  %vm1048_vm15 = vc.u32 %v1046_v5, %v1042_v49  ;;  %v1043_v43 = vshrl.u32 %v1038_v44, 16 }
  0x8b   :  { %v770_v37 = vmul.f32 %v769_v22, %v767_v27  ;;  %v1025_v55 = vadd.s32 %v1023_v1, %v1017_v54  ;;  %vm1026_vm0 = vc.u32 %v1024_v48, %v1020_v40  ;;  %v1049_v36 = vsel %vm1048_vm15, 1, %v1381_v52 }
  0x8c   :  { %v1027_v42 = vsel %vm1026_vm0, 1, %v1381_v52  ;;  %v1051_v2 = vadd.s32 %v1049_v36, %v1047_v18  ;;  %v776_v26 = vsel %vm1801_vm11, 0, %v774_v23  ;;  %v1021_v57 = vshrl.u32 %v1016_v35, 16 }
  0x8d   :  { %v771_v51 = vxor.u32 2147483648, %v770_v37  ;;  %v1029_v58 = vadd.s32 %v1027_v42, %v1025_v55  ;;  %v1000_v59 = vsel %vm994_vm10, %v997_v4, %v999_v14  ;;  %v1050_v20 = vadd.s32 %v1046_v5, %v1042_v49 }
  0x8e   :  { %v1052_v61 = vadd.s32 %v1051_v2, %v1041_v8  ;;  %v793_v7 = vadd.s32 3, %v776_v26  ;;  %v1054_v60 = vmul.u32 %v1775_v38, %v1000_v59  ;;  %v949_v30 = vand.u32 3, %v776_v26 }
  0x8f   :  { %v772_v56 = vsel %vm651_vm12, %v771_v51, %v770_v37  ;;  %v1030_v47 = vadd.s32 %v1029_v58, %v1019_v6  ;;  %vm792_vm8 = vweird.f32 %v1405_v3  ;;  %vm962_vm12 = vcmp.le.f32.partialorder %v961_v9, 0.7853982 }
  0x90   :  { %v775_v34 = vsel %vm1801_vm11, %v1405_v3, %v772_v56  ;;  %v1053_v11 = vadd.s32 %v1052_v61, %v1043_v43  ;;  %v794_v13 = vand.u32 3, %v793_v7  ;;  %vm954_vm3 = vcmp.eq.s32.totalorder %v949_v30, 2 }
  0x91   :  { %v777_v45 = vmul.f32 %v775_v34, %v775_v34  ;;  %v1031_v52 = vadd.s32 %v1030_v47, %v1021_v57  ;;  %vm951_vm6 = vcmp.eq.s32.totalorder %v949_v30, 0  ;;  %vm950_vm7 = vcmp.lt.s32.totalorder %v949_v30, 2 }
  0x92   :  { %v1057_v21 = vadd.s32 1, %v1053_v11  ;;  %vm799_vm2 = vcmp.eq.s32.totalorder %v794_v13, 2  ;;  %vm795_vm4 = vcmp.lt.s32.totalorder %v794_v13, 2  ;;  %vm796_vm5 = vcmp.eq.s32.totalorder %v794_v13, 0 }
  0x93   :  { %v778_v12 = vmul.f32 -0.001358992, %v777_v45  ;;  %v785_v29 = vmul.f32 -0.00019511016, %v777_v45  ;;  %vm1056_vm1 = vc.u32 %v1031_v52, %v1050_v20  ;;  %v1055_v5 = vadd.s32 %v1050_v20, %v1031_v52 }
  0x94   :  { %v1058_v15 = vsel %vm1056_vm1, %v1057_v21, %v1053_v11  ;;  %vm963_vm11 = vcmp.lt.s32.totalorder %v1695_v50, 0 }
  0x95   :  { %v779_v25 = vadd.f32 0.041655596, %v778_v12  ;;  %v786_v10 = vadd.f32 0.008332121, %v785_v29  ;;  %v1059_v22 = vadd.s32 %v1058_v15, %v1054_v60 }
  0x97   :  { %v780_v16 = vmul.f32 %v779_v25, %v777_v45  ;;  %v787_v63 = vmul.f32 %v786_v10, %v777_v45  ;;  %v1060_v28 = vadd.s32 536870912, %v1059_v22 }
  0x99   :  { %v781_v41 = vadd.f32 -0.4999988, %v780_v16  ;;  %v788_v24 = vadd.f32 -0.16666654, %v787_v63  ;;  %v1061_v0 = vshrl.u32 %v1060_v28, 30 }
  0x9b   :  { %v782_v23 = vmul.f32 %v781_v41, %v777_v45  ;;  %v789_v31 = vmul.f32 %v788_v24, %v777_v45  ;;  %v1062_v44 = vshll.u32 %v1061_v0, 30  ;;  %v1085_v43 = vsub.s32 4, %v1061_v0 }
  0x9d   :  { %v783_v19 = vadd.f32 1.0, %v782_v23  ;;  %v790_v27 = vadd.f32 1.0, %v789_v31  ;;  %v1063_v35 = vsub.s32 %v1059_v22, %v1062_v44  ;;  %v1086_v57 = vsel %vm963_vm11, %v1085_v43, %v1061_v0 }
  0x9e   :  { %v1088_v29 = vsel %vm962_vm12, 0, %v1086_v57 }
  0x9f   :  { %v791_v17 = vmul.f32 %v790_v27, %v775_v34  ;;  %v800_v38 = vxor.u32 2147483648, %v783_v19  ;;  %vm1064_vm9 = vcmp.lt.s32.totalorder %v1063_v35, 0  ;;  %v1065_v14 = vsub.s32 0, %v1063_v35 }
  0xa0   :  { %v1105_v25 = vadd.s32 3, %v1088_v29  ;;  %v1261_v16 = vand.u32 3, %v1088_v29 }
  0xa1   :  { %v797_v4 = vxor.u32 2147483648, %v791_v17  ;;  %v801_v62 = vsel %vm799_vm2, %v800_v38, %v791_v17  ;;  %v956_v33 = vsel %vm954_vm3, %v800_v38, %v791_v17  ;;  %v1066_v40 = vsel %vm1064_vm9, %v1065_v14, %v1063_v35 }
  0xa2   :  { %v1067_v51 = vclz %v1066_v40  ;;  %v1106_v60 = vand.u32 3, %v1105_v25  ;;  %vm1266_vm14 = vcmp.eq.s32.totalorder %v1261_v16, 2  ;;  %vm1263_vm1 = vcmp.eq.s32.totalorder %v1261_v16, 0 }
  0xa3   :  { %v798_v37 = vsel %vm796_vm5, %v783_v19, %v797_v4  ;;  %v953_v46 = vsel %vm951_vm6, %v783_v19, %v797_v4  ;;  %vm1262_vm2 = vcmp.lt.s32.totalorder %v1261_v16, 2  ;;  %vm1104_vm3 = vweird.f32 %v1695_v50 }
  0xa4   :  { %v802_v32 = vsel %vm795_vm4, %v798_v37, %v801_v62  ;;  %v957_v49 = vsel %vm950_vm7, %v953_v46, %v956_v33  ;;  %v1308_v8 = vadd.s32 4294967294, %v1067_v51  ;;  %vm1111_vm13 = vcmp.eq.s32.totalorder %v1106_v60, 2 }
  0xa5   :  { %v803_v54 = vsel %vm792_vm8, nan, %v802_v32  ;;  %v958_v53 = vsel %vm792_vm8, nan, %v957_v49  ;;  %vm1107_vm15 = vcmp.lt.s32.totalorder %v1106_v60, 2  ;;  %vm1108_vm0 = vcmp.eq.s32.totalorder %v1106_v60, 0 }
  0xa6   :  { %804 = vst [vmem:[#allocation5 + $0x2] sm:$0x1] %v803_v54  ;;  %vm1309_vm10 = vcmp.lt.s32.totalorder %v1308_v8, 0 }
  0xa7   :  { %959 = vst [vmem:[#allocation5 + $0x6] sm:$0x1] %v958_v53  ;;  %v1070_v6 = vsel %vm1309_vm10, 0, %v1308_v8 }
  0xa8   :  { %v1071_v48 = vsub.s32 32, %v1070_v6  ;;  %v1072_v39 = vshll.u32 %v1063_v35, %v1070_v6  ;;  %v1075_v3 = vsub.s32 4294967266, %v1070_v6 }
  0xaa   :  { %v1073_v56 = vshrl.u32 %v1055_v5, %v1071_v48  ;;  %v1076_v1 = vadd.s32 127, %v1075_v3 }
  0xac   :  { %v1074_v18 = vor.u32 %v1073_v56, %v1072_v39  ;;  %v1077_v34 = vshll.u32 %v1076_v1, 23 }
  0xae   :  { %v1078_v55 = vor.u32 4788187, %v1077_v34  ;;  %v1081_v36 = vcvt.s32.f32 %v1074_v18 }
  0xb0   :  { %v1079_v45 = vand.u32 2147483647, %v1078_v55 }
  0xb2   :  { %v1082_v42 = vmul.f32 %v1081_v36, %v1079_v45 }
  0xb4   :  { %v1083_v2 = vxor.u32 2147483648, %v1082_v42 }
  0xb6   :  { %v1084_v26 = vsel %vm963_vm11, %v1083_v2, %v1082_v42 }
  0xb7   :  { %v1087_v58 = vsel %vm962_vm12, %v1695_v50, %v1084_v26 }
  0xb8   :  { %v1089_v12 = vmul.f32 %v1087_v58, %v1087_v58 }
  0xba   :  { %v1090_v59 = vmul.f32 -0.001358992, %v1089_v12  ;;  %v1097_v61 = vmul.f32 -0.00019511016, %v1089_v12 }
  0xbc   :  { %v1091_v47 = vadd.f32 0.041655596, %v1090_v59  ;;  %v1098_v20 = vadd.f32 0.008332121, %v1097_v61 }
  0xbe   :  { %v1092_v10 = vmul.f32 %v1091_v47, %v1089_v12  ;;  %v1099_v11 = vmul.f32 %v1098_v20, %v1089_v12 }
  0xc0   :  { %v1093_v7 = vadd.f32 -0.4999988, %v1092_v10  ;;  %v1100_v52 = vadd.f32 -0.16666654, %v1099_v11 }
  0xc2   :  { %v1094_v63 = vmul.f32 %v1093_v7, %v1089_v12  ;;  %v1101_v9 = vmul.f32 %v1100_v52, %v1089_v12 }
  0xc4   :  { %v1095_v21 = vadd.f32 1.0, %v1094_v63  ;;  %v1102_v41 = vadd.f32 1.0, %v1101_v9 }
  0xc6   :  { %v1103_v24 = vmul.f32 %v1102_v41, %v1087_v58  ;;  %v1112_v15 = vxor.u32 2147483648, %v1095_v21 }
  0xc8   :  { %v1109_v13 = vxor.u32 2147483648, %v1103_v24  ;;  %v1113_v30 = vsel %vm1111_vm13, %v1112_v15, %v1103_v24  ;;  %v1268_v22 = vsel %vm1266_vm14, %v1112_v15, %v1103_v24 }
  0xca   :  { %v1110_v23 = vsel %vm1108_vm0, %v1095_v21, %v1109_v13  ;;  %v1265_v31 = vsel %vm1263_vm1, %v1095_v21, %v1109_v13 }
  0xcb   :  { %v1114_v28 = vsel %vm1107_vm15, %v1110_v23, %v1113_v30  ;;  %v1269_v19 = vsel %vm1262_vm2, %v1265_v31, %v1268_v22 }
  0xcc   :  { %v1115_v27 = vsel %vm1104_vm3, nan, %v1114_v28  ;;  %v1270_v0 = vsel %vm1104_vm3, nan, %v1269_v19 }
  0xcd   :  { %1116 = vst [vmem:[#allocation5 + $0x3] sm:$0x1] %v1115_v27 }
  0xce   :  { %1271 = vst [vmem:[#allocation5 + $0x7] sm:$0x1] %v1270_v0 }
  0xcf   :  { %1282 = dma.vmem_to_hbm [thread:$0]  %s1278_s11, 128, %s1280_s14, [#allocation4]  }
  0xd0   :  { %1372 = dma.done.wait [#allocation4], 128  }
  0xd1   :  { %1373 = vsyncadd [#allocation4], 4294967168 }
  0xd2   :  { %1287 = vsyncpa [#allocation3], 1 }
  0xd3   :  { %1288 = vsyncpa [#allocation4], 1 }

</bundles_post_ra>
